<compile_context>
chip_gen: v6e
topology: v6e:2x2x1
jax: 0.10.0
libtpu: 0.0.40
codegen_flags: <defaults>
</compile_context>

<pallas_src>
import functools

import jax
import jax.numpy as jnp
from jax.experimental import pallas as pl
from jax.experimental.pallas import tpu as pltpu

ALPHA = 50.0
BETA = 1.0


def _round_up(x, m):
    return (x + m - 1) // m * m


def _stack_gcn_kernel(n_self_ref, sup_ref, x_ref, w_ref, out_ref, *, num_support, d_sub):
    """One grid step == one side (0: lnc, 1: dis): GCN + degenerate-softmax CRF + relu."""
    side = pl.program_id(0)
    # True (unpadded) node count of this side, prefetched into SMEM.
    n_self = n_self_ref[side].astype(jnp.float32)
    inv_const = 1.0 / (n_self * BETA + ALPHA)           # coefs == 1  ->  coefs @ ones == N

    x_other = x_ref[0]                                   # (M_pad, D_in)
    w_all = w_ref[...]                                   # (D_in, S*d_sub)

    # Stage 1: a single lane-dense matmul covering all supports (256-wide MXU push).
    tmp_all = jnp.dot(x_other, w_all, preferred_element_type=jnp.float32)   # (M_pad, S*d_sub)
    tmp_all_mm = tmp_all.astype(w_all.dtype)             # back to matmul dtype for stage 2

    for i in range(num_support):                         # small static unroll (S supports)
        sup = sup_ref[0, i]                              # (N_pad, M_pad)
        tmp_i = tmp_all_mm[:, i * d_sub:(i + 1) * d_sub]  # static, lane-aligned slice

        # Stage 2: GCN message passing.
        hidden = jnp.dot(sup, tmp_i, preferred_element_type=jnp.float32)    # (N_pad, d_sub)

        # CRF column-sum as a matmul against the row-reduced support:
        #   colsum(sup @ tmp) == colsum(sup) @ tmp   (padded rows are zero -> exact).
        sup_colsum = jnp.sum(sup.astype(jnp.float32), axis=0, keepdims=True)  # (1, M_pad)
        colsum = jnp.dot(sup_colsum.astype(sup.dtype), tmp_i,
                         preferred_element_type=jnp.float32)                  # (1, d_sub)

        hidden_crf = (BETA * colsum + ALPHA * hidden) * inv_const

        # activation = relu, use_bias=False; direct lane-aligned slice store (no concat).
        out_ref[0, :, i * d_sub:(i + 1) * d_sub] = jnp.maximum(hidden_crf, 0.0)


def stack_gcn_encoder_forward(params, lnc_supports, dis_supports, lnc_inputs, dis_inputs,
                              *, matmul_dtype=jnp.bfloat16):
    """Fused forward: one pallas_call, grid axis = side (0: lnc, 1: dis)."""
    # NOTE: weight_lnc / weight_dis and the per-call random Conv1d stand-ins of the torch
    # reference have zero effect on the output (implicit-dim softmax over a size-1 axis
    # gives coefs == 1), so they are intentionally NOT fed to the kernel.
    weight = params["weight"]                             # (S, D_in, d_sub)
    S, D_in, d_sub = weight.shape
    num_lnc = lnc_inputs.shape[0]
    num_dis = dis_inputs.shape[0]

    n_pad = _round_up(max(num_lnc, num_dis), 8)
    m_pad = n_pad                                         # "other"-side dims are the same two counts, swapped

    def pad_rows(a, rows):
        return jnp.pad(a, ((0, rows - a.shape[0]), (0, 0)))

    # Supports, zero-padded and stacked over the side axis: (2, S, n_pad, m_pad).
    sup_lnc = jnp.pad(lnc_supports, ((0, 0), (0, n_pad - num_lnc), (0, m_pad - num_dis)))
    sup_dis = jnp.pad(dis_supports, ((0, 0), (0, n_pad - num_dis), (0, m_pad - num_lnc)))
    sup_all = jnp.stack([sup_lnc, sup_dis]).astype(matmul_dtype)

    # Other-side inputs (side 0 consumes dis_inputs, side 1 consumes lnc_inputs),
    # zero-padded rows so padded support columns contribute exactly zero.
    x_other_all = jnp.stack([pad_rows(dis_inputs, m_pad),
                             pad_rows(lnc_inputs, m_pad)]).astype(matmul_dtype)

    # Weight reshaped lane-dense: (D_in, S*d_sub), column block i == W[i].
    w_r = jnp.transpose(weight, (1, 0, 2)).reshape(D_in, S * d_sub).astype(matmul_dtype)

    # True node counts per side (scalar prefetch -> SMEM).
    n_self = jnp.array([num_lnc, num_dis], dtype=jnp.int32)

    kernel = functools.partial(_stack_gcn_kernel, num_support=S, d_sub=d_sub)

    out = pl.pallas_call(
        kernel,
        out_shape=jax.ShapeDtypeStruct((2, n_pad, S * d_sub), jnp.float32),
        grid_spec=pltpu.PrefetchScalarGridSpec(
            num_scalar_prefetch=1,
            grid=(2,),
            in_specs=[
                pl.BlockSpec((1, S, n_pad, m_pad), lambda s, n: (s, 0, 0, 0)),   # supports
                pl.BlockSpec((1, m_pad, D_in), lambda s, n: (s, 0, 0)),          # other inputs
                pl.BlockSpec((D_in, S * d_sub), lambda s, n: (0, 0)),            # shared W
            ],
            out_specs=pl.BlockSpec((1, n_pad, S * d_sub), lambda s, n: (s, 0, 0)),
        ),
        compiler_params=pltpu.CompilerParams(
            dimension_semantics=("parallel",),            # v7x: sides split across TensorCores
            vmem_limit_bytes=32 * 1024 * 1024,
        ),
    )(n_self, sup_all, x_other_all, w_r)

    # TODO(synk): torch uses sparse adjacency supports (torch.sparse.mm); represented densely
    # here.  At large node counts, add an N-tiled grid axis (the colsum-from-support form
    # above already makes that correct) instead of full-extent blocks.
    return out[0, :num_lnc], out[1, :num_dis]


def reference_forward(lnc_supports, dis_supports, lnc_inputs, dis_inputs, weight):
    """Plain-JAX f32 reference of the torch forward (implicit-dim softmax -> coefs == 1)."""
    alpha, beta = ALPHA, BETA

    def crf(h):
        n = h.shape[0]
        coefs = jnp.ones((n, n), jnp.float32)
        res = coefs @ h
        hidden_crf = beta * res + alpha * h
        const = beta * (coefs @ jnp.ones_like(h)) + alpha
        return hidden_crf / const

    lnc_blocks, dis_blocks = [], []
    for i in range(weight.shape[0]):
        tmp_u = lnc_inputs @ weight[i]
        tmp_v = dis_inputs @ weight[i]
        lnc_blocks.append(crf(lnc_supports[i] @ tmp_v))
        dis_blocks.append(crf(dis_supports[i] @ tmp_u))
    lnc_h = jnp.concatenate(lnc_blocks, axis=1)
    dis_h = jnp.concatenate(dis_blocks, axis=1)
    return jax.nn.relu(lnc_h), jax.nn.relu(dis_h)


def make_params(key, num_support, input_dim, d_sub, num_lnc, num_dis):
    ks = jax.random.split(key, 3)

    def kuniform(k, shape, fan_in):
        bound = (6.0 / fan_in) ** 0.5
        return jax.random.uniform(k, shape, jnp.float32, -bound, bound)

    return {
        # nn.Parameter shapes from __init__ (kaiming_uniform init)
        "weight":     kuniform(ks[0], (num_support, input_dim, d_sub), input_dim * d_sub),
        # weight_lnc / weight_dis exist in the module but are provably dead inputs
        # (implicit-dim softmax over the size-1 axis gives coefs == 1); kept for parity only.
        "weight_lnc": kuniform(ks[1], (num_lnc, num_lnc), num_lnc * num_lnc),
        "weight_dis": kuniform(ks[2], (num_dis, num_dis), num_dis * num_dis),
    }


if __name__ == "__main__":
    # Small synthetic sizes consistent with the module's forward.
    num_support = 2
    input_dim = 32
    d_sub = 128                       # output_dim // num_support
    num_lnc = 16
    num_dis = 24

    key = jax.random.PRNGKey(0)
    k_in, k_sup, k_par = jax.random.split(key, 3)
    k1, k2 = jax.random.split(k_in)
    k3, k4 = jax.random.split(k_sup)

    lnc_inputs = jax.random.normal(k1, (num_lnc, input_dim), jnp.float32)
    dis_inputs = jax.random.normal(k2, (num_dis, input_dim), jnp.float32)
    lnc_supports = jax.random.uniform(k3, (num_support, num_lnc, num_dis), jnp.float32)
    dis_supports = jax.random.uniform(k4, (num_support, num_dis, num_lnc), jnp.float32)

    params = make_params(k_par, num_support, input_dim, d_sub, num_lnc, num_dis)

    ref_lnc, ref_dis = reference_forward(
        lnc_supports, dis_supports, lnc_inputs, dis_inputs, params["weight"])

    # f32 matmul path: tight check.
    lnc_f32, dis_f32 = stack_gcn_encoder_forward(
        params, lnc_supports, dis_supports, lnc_inputs, dis_inputs,
        matmul_dtype=jnp.float32)
    jax.block_until_ready((lnc_f32, dis_f32))
    assert lnc_f32.shape == (num_lnc, num_support * d_sub)
    assert dis_f32.shape == (num_dis, num_support * d_sub)
    assert jnp.allclose(lnc_f32, ref_lnc, rtol=1e-3, atol=1e-3)
    assert jnp.allclose(dis_f32, ref_dis, rtol=1e-3, atol=1e-3)

    # bf16 matmul-operand path (the v6e/v7x/v5e production setting): looser check.
    lnc_out, dis_out = stack_gcn_encoder_forward(
        params, lnc_supports, dis_supports, lnc_inputs, dis_inputs,
        matmul_dtype=jnp.bfloat16)
    jax.block_until_ready((lnc_out, dis_out))
    assert jnp.allclose(lnc_out, ref_lnc, rtol=2e-2, atol=2e-2)
    assert jnp.allclose(dis_out, ref_dis, rtol=2e-2, atol=2e-2)

    print("KERNEL_OK")
</pallas_src>

<mosaic_0001>
module attributes {stable_mosaic.version = 11 : i64} {
  func.func @_stack_gcn_kernel(%arg0: i32, %arg1: memref<2xi32, #tpu.memory_space<smem>>, %arg2: memref<1x2x24x24xf32, #tpu.memory_space<vmem>>, %arg3: memref<1x24x32xf32, #tpu.memory_space<vmem>>, %arg4: memref<32x256xf32, #tpu.memory_space<vmem>>, %arg5: memref<1x24x256xf32, #tpu.memory_space<vmem>>) attributes {dimension_semantics = [#tpu.dimension_semantics<parallel>], iteration_bounds = array<i64: 2>, scalar_prefetch = 1 : i64, scratch_operands = 0 : i64, tpu.core_type = #tpu.core_type<tc>, window_params = [{transform_indices = @transform_0, window_bounds = array<i64: 1, 2, 24, 24>}, {transform_indices = @transform_1, window_bounds = array<i64: 1, 24, 32>}, {pipeline_mode = #tpu.pipeline_mode<synchronous>, transform_indices = @transform_2, window_bounds = array<i64: 32, 256>}, {transform_indices = @transform_3, window_bounds = array<i64: 1, 24, 256>}]} {
    %0 = arith.index_cast %arg0 : i32 to index
    %1 = memref.load %arg1[%0] : memref<2xi32, #tpu.memory_space<smem>>
    %2 = arith.sitofp %1 : i32 to f32
    %cst = arith.constant 1.000000e+00 : f32
    %3 = arith.mulf %2, %cst : f32
    %cst_0 = arith.constant 5.000000e+01 : f32
    %4 = arith.addf %3, %cst_0 : f32
    %cst_1 = arith.constant 1.000000e+00 : f32
    %5 = arith.divf %cst_1, %4 : f32
    %c0 = arith.constant 0 : index
    %c0_2 = arith.constant 0 : index
    %c0_3 = arith.constant 0 : index
    %6 = vector.load %arg3[%c0, %c0_2, %c0_3] : memref<1x24x32xf32, #tpu.memory_space<vmem>>, vector<1x24x32xf32>
    %7 = vector.shape_cast %6 : vector<1x24x32xf32> to vector<24x32xf32>
    %c0_4 = arith.constant 0 : index
    %c0_5 = arith.constant 0 : index
    %8 = vector.load %arg4[%c0_4, %c0_5] : memref<32x256xf32, #tpu.memory_space<vmem>>, vector<32x256xf32>
    %cst_6 = arith.constant dense<0.000000e+00> : vector<24x256xf32>
    %9 = tpu.matmul %7, %8, %cst_6 {dimension_numbers = #tpu.dot_dimension_numbers<[1], [0], [0], [1], [0, 0, 1, 1], [], []>} : vector<24x32xf32>, vector<32x256xf32>, vector<24x256xf32> -> vector<24x256xf32>
    %c0_7 = arith.constant 0 : index
    %c0_8 = arith.constant 0 : index
    %c0_9 = arith.constant 0 : index
    %c0_10 = arith.constant 0 : index
    %10 = vector.load %arg2[%c0_7, %c0_8, %c0_9, %c0_10] : memref<1x2x24x24xf32, #tpu.memory_space<vmem>>, vector<1x1x24x24xf32>
    %11 = vector.shape_cast %10 : vector<1x1x24x24xf32> to vector<24x24xf32>
    %12 = vector.extract_strided_slice %9 {offsets = [0, 0], sizes = [24, 128], strides = [1, 1]} : vector<24x256xf32> to vector<24x128xf32>
    %cst_11 = arith.constant dense<0.000000e+00> : vector<24x128xf32>
    %13 = tpu.matmul %11, %12, %cst_11 {dimension_numbers = #tpu.dot_dimension_numbers<[1], [0], [0], [1], [0, 0, 1, 1], [], []>} : vector<24x24xf32>, vector<24x128xf32>, vector<24x128xf32> -> vector<24x128xf32>
    %cst_12 = arith.constant dense<0.000000e+00> : vector<24xf32>
    %14 = vector.multi_reduction <add>, %11, %cst_12 [0] : vector<24x24xf32> to vector<24xf32>
    %15 = vector.shape_cast %14 : vector<24xf32> to vector<1x24xf32>
    %cst_13 = arith.constant dense<0.000000e+00> : vector<1x128xf32>
    %16 = tpu.matmul %15, %12, %cst_13 {dimension_numbers = #tpu.dot_dimension_numbers<[1], [0], [0], [1], [0, 0, 1, 1], [], []>} : vector<1x24xf32>, vector<24x128xf32>, vector<1x128xf32> -> vector<1x128xf32>
    %cst_14 = arith.constant 1.000000e+00 : f32
    %17 = vector.broadcast %cst_14 : f32 to vector<1x128xf32>
    %18 = arith.mulf %17, %16 : vector<1x128xf32>
    %cst_15 = arith.constant 5.000000e+01 : f32
    %19 = vector.broadcast %cst_15 : f32 to vector<24x128xf32>
    %20 = arith.mulf %19, %13 : vector<24x128xf32>
    %21 = vector.broadcast %18 : vector<1x128xf32> to vector<24x128xf32>
    %22 = arith.addf %21, %20 : vector<24x128xf32>
    %23 = vector.broadcast %5 : f32 to vector<24x128xf32>
    %24 = arith.mulf %22, %23 : vector<24x128xf32>
    %cst_16 = arith.constant 0.000000e+00 : f32
    %25 = vector.broadcast %cst_16 : f32 to vector<24x128xf32>
    %26 = arith.maximumf %24, %25 : vector<24x128xf32>
    %c0_17 = arith.constant 0 : index
    %c0_18 = arith.constant 0 : index
    %c0_19 = arith.constant 0 : index
    %27 = vector.load %arg5[%c0_17, %c0_18, %c0_19] : memref<1x24x256xf32, #tpu.memory_space<vmem>>, vector<1x24x128xf32>
    %28 = vector.shape_cast %27 : vector<1x24x128xf32> to vector<24x128xf32>
    %29 = vector.shape_cast %26 : vector<24x128xf32> to vector<1x24x128xf32>
    tpu.vector_store %arg5[%c0_17, %c0_18, %c0_19], %29 {strides = array<i32>} : memref<1x24x256xf32, #tpu.memory_space<vmem>>, vector<1x24x128xf32>,
    %c0_20 = arith.constant 0 : index
    %c1 = arith.constant 1 : index
    %c0_21 = arith.constant 0 : index
    %c0_22 = arith.constant 0 : index
    %30 = vector.load %arg2[%c0_20, %c1, %c0_21, %c0_22] : memref<1x2x24x24xf32, #tpu.memory_space<vmem>>, vector<1x1x24x24xf32>
    %31 = vector.shape_cast %30 : vector<1x1x24x24xf32> to vector<24x24xf32>
    %32 = vector.extract_strided_slice %9 {offsets = [0, 128], sizes = [24, 128], strides = [1, 1]} : vector<24x256xf32> to vector<24x128xf32>
    %cst_23 = arith.constant dense<0.000000e+00> : vector<24x128xf32>
    %33 = tpu.matmul %31, %32, %cst_23 {dimension_numbers = #tpu.dot_dimension_numbers<[1], [0], [0], [1], [0, 0, 1, 1], [], []>} : vector<24x24xf32>, vector<24x128xf32>, vector<24x128xf32> -> vector<24x128xf32>
    %cst_24 = arith.constant dense<0.000000e+00> : vector<24xf32>
    %34 = vector.multi_reduction <add>, %31, %cst_24 [0] : vector<24x24xf32> to vector<24xf32>
    %35 = vector.shape_cast %34 : vector<24xf32> to vector<1x24xf32>
    %cst_25 = arith.constant dense<0.000000e+00> : vector<1x128xf32>
    %36 = tpu.matmul %35, %32, %cst_25 {dimension_numbers = #tpu.dot_dimension_numbers<[1], [0], [0], [1], [0, 0, 1, 1], [], []>} : vector<1x24xf32>, vector<24x128xf32>, vector<1x128xf32> -> vector<1x128xf32>
    %cst_26 = arith.constant 1.000000e+00 : f32
    %37 = vector.broadcast %cst_26 : f32 to vector<1x128xf32>
    %38 = arith.mulf %37, %36 : vector<1x128xf32>
    %cst_27 = arith.constant 5.000000e+01 : f32
    %39 = vector.broadcast %cst_27 : f32 to vector<24x128xf32>
    %40 = arith.mulf %39, %33 : vector<24x128xf32>
    %41 = vector.broadcast %38 : vector<1x128xf32> to vector<24x128xf32>
    %42 = arith.addf %41, %40 : vector<24x128xf32>
    %43 = vector.broadcast %5 : f32 to vector<24x128xf32>
    %44 = arith.mulf %42, %43 : vector<24x128xf32>
    %cst_28 = arith.constant 0.000000e+00 : f32
    %45 = vector.broadcast %cst_28 : f32 to vector<24x128xf32>
    %46 = arith.maximumf %44, %45 : vector<24x128xf32>
    %c0_29 = arith.constant 0 : index
    %c0_30 = arith.constant 0 : index
    %c128 = arith.constant 128 : index
    %47 = vector.load %arg5[%c0_29, %c0_30, %c128] : memref<1x24x256xf32, #tpu.memory_space<vmem>>, vector<1x24x128xf32>
    %48 = vector.shape_cast %47 : vector<1x24x128xf32> to vector<24x128xf32>
    %49 = vector.shape_cast %46 : vector<24x128xf32> to vector<1x24x128xf32>
    tpu.vector_store %arg5[%c0_29, %c0_30, %c128], %49 {strides = array<i32>} : memref<1x24x256xf32, #tpu.memory_space<vmem>>, vector<1x24x128xf32>,
    return
  }
  func.func @transform_0(%arg0: i32, %arg1: memref<2xi32, #tpu.memory_space<smem>>) -> (i32, i32, i32, i32) {
    %c0_i32 = arith.constant 0 : i32
    %c0_i32_0 = arith.constant 0 : i32
    %c0_i32_1 = arith.constant 0 : i32
    %c0_i32_2 = arith.constant 0 : i32
    return %arg0, %c0_i32, %c0_i32_0, %c0_i32_1 : i32, i32, i32, i32
  }
  func.func @transform_1(%arg0: i32, %arg1: memref<2xi32, #tpu.memory_space<smem>>) -> (i32, i32, i32) {
    %c0_i32 = arith.constant 0 : i32
    %c0_i32_0 = arith.constant 0 : i32
    %c0_i32_1 = arith.constant 0 : i32
    return %arg0, %c0_i32, %c0_i32_0 : i32, i32, i32
  }
  func.func @transform_2(%arg0: i32, %arg1: memref<2xi32, #tpu.memory_space<smem>>) -> (i32, i32) {
    %c0_i32 = arith.constant 0 : i32
    %c0_i32_0 = arith.constant 0 : i32
    %c0_i32_1 = arith.constant 0 : i32
    return %c0_i32, %c0_i32_0 : i32, i32
  }
  func.func @transform_3(%arg0: i32, %arg1: memref<2xi32, #tpu.memory_space<smem>>) -> (i32, i32, i32) {
    %c0_i32 = arith.constant 0 : i32
    %c0_i32_0 = arith.constant 0 : i32
    %c0_i32_1 = arith.constant 0 : i32
    return %arg0, %c0_i32, %c0_i32_0 : i32, i32, i32
  }
}

</mosaic_0001>

<bundles_post_ra>
// kernel: tpu_custom_call.1
= control target key start
LH: loop header
LB: loop body
LE: loop exit
PB: predicated region body
PF: predicated region fallthrough
CT: control target
= control target key end

     0   :  { %s1211_s15 = smov [#allocation3]   ;;  %s1545_s0 = inlined_call_operand.hbm [shape: s32[2], index: 0, kind: input, shape index: {}]   ;;  %s1546_s1 = inlined_call_operand.hbm [shape: f32[2,2,24,24], index: 1, kind: input, shape index: {}]   ;;  %s1547_s2 = inlined_call_operand.hbm [shape: f32[2,24,32], index: 2, kind: input, shape index: {}]   ;;  %s1548_s3 = inlined_call_operand.hbm [shape: f32[32,256], index: 3, kind: input, shape index: {}]   ;;  %s1549_s4 = inlined_call_operand.hbm [shape: f32[2,24,256], index: 4, kind: output, shape index: {}]  }
   0x1   :  { %1553 = sst [smem:[#allocation16_spill]] %s1546_s1 }
   0x2   :  { %10 = dma.hbm_to_smem %s1545_s0, 16, %s1211_s15, [#allocation2] }
   0x3   :  { %1177 = dma.done.wait [#allocation2], 16 }
   0x4   :  { %1178 = vsyncadd [#allocation2], 4294967280 }
   0x5   :  { %12 = sfence }
   0x6   :  { %13 = vsyncpa [#allocation5], 0 }
   0x7   :  { %15 = vsyncpa [#allocation5 + $0x1], 0 }
   0x8   :  { %16 = vsyncpa [#allocation8], 0 }
   0x9   :  { %18 = vsyncpa [#allocation8 + $0x1], 0 }
   0xa   :  { %19 = vsyncpa [#allocation6], 0 }
   0xb   :  { %21 = vsyncpa [#allocation6 + $0x1], 0  ;;  %s1252_s18 = smov 0   ;;  %s1254_s19 = smov 0  }
   0xc   :  { %s1256_s20 = smov 0   ;;  %s1258_s21 = smov 0  }
   0xd LB: > { %s1273_s0 = sadd.s32 4294967295, %s1209_s21   ;;  %s870_s22 = sadd.s32 4294967294, %s1209_s21   ;;  %s1209_s21 = sphi %s1258_s21, %s1571_s21   ;;  %s1205_s20 = sphi %s1256_s20, %s1570_s20   ;;  %s1201_s19 = sphi %s1254_s19, %s1569_s19   ;;  %s1197_s18 = sphi %s1252_s18, %s1568_s18  }
   0xe   : > { %p47_p0 = scmp.ne.s32.totalorder %s1201_s19, %s1197_s18  ;;  %p1550_p1 = scmp.eq.s32.totalorder %s1273_s0, 0 }
   0xf   : > { %p124_p3 = scmp.eq.s32.totalorder %s870_s22, 1  ;;  %p871_p5 = scmp.ge.s32.totalorder %s1209_s21, 1 }
  0x10   : > { %p1282_p4 = por %p1550_p1, %p47_p0  ;;  %p131_p7 = scmp.lt.s32.totalorder %s1209_s21, 3 }
  0x11   : > { %p1287_p6 = por %p124_p3, %p47_p0  ;;  %s1212_s26 = smov [#allocation9]  }
  0x12   : > { %s1554_s23 = scalar_select %p1282_p4, 1, 0 }
  0x13   : > { %s1555_s24 = scalar_select %p1287_p6, 1, 0 }
  0x14   : > { %p1292_p8 = pnand %p871_p5, %p131_p7  ;;  %s143_s27 = sshll.u32 %s1212_s26, 4  ;;  %s144_s27 = int_to_ptr.vmem [resolvable:$true] %s143_s27 }
  0x15   : > { %s1306_s29 = sadd.s32 1, %s1209_s21   ;;  %s34_s30 = sadd.s32 1, %s1205_s20 }
  0x16   : > { %p982_p9 = pneg %p1292_p8  ;;  %s31_s5 = ssub.s32 %s1209_s21, %s1306_s29 }
  0x17   : > { %s1064_s6 = scalar_lea.vmem %s144_s27, 1024  ;;  %p1072_p5 = scmp.lt.s32.totalorder %s144_s27, %s144_s27 }
  0x18   : > { %p1301_p11 = pnand %p982_p9, %p1550_p1  ;;  %p1065_p13 = scmp.ne.s32.totalorder %s144_s27, %s1064_s6 }
  0x19   : > { %p1073_p7 = scmp.lt.s32.totalorder %s1064_s6, %s1064_s6 }
  0x1a   : > { %p1055_p12 = pneg %p1301_p11 }
  0x1b   : > { %p1074_p10 = por %p1073_p7, %p1072_p5 }
  0x1c   : > { %p1067_p0 = pnand %p1065_p13, %p1055_p12 }
  0x1e   : > { %p1068_p3 = pneg %p1067_p0 }
  0x20   : > { %p1075_p2 = pnand %p1074_p10, %p1068_p3 }
  0x22   : > { %1078 = shalt.err (!%p1075_p2)
}
  0x23   : > { %s1213_s7 = smov 256   ;;  %s1214_s8 = smov 16  }
  0x24   : > { %985 = dma.hbm_to_vmem [thread:$0]  (!%p1301_p11), %s1548_s3, 1024, %s144_s27, [#allocation8], %s1213_s7, %s1213_s7, %s1214_s8  }
  0x25   : > { %p32_p9 = scmp.eq.s32.totalorder %s31_s5, 0  ;;  %p41_p12 = scmp.ne.s32.totalorder %s1205_s20, %s1201_s19 }
  0x26   : > { %p42_p10 = scmp.eq.s32.totalorder %s1209_s21, 0  ;;  %p998_p2 = scmp.lt.s32.totalorder %s1209_s21, 2 }
  0x27   : > { %s1323_s11 = scalar_select %p32_p9, %s1205_s20, %s34_s30  }
  0x28   : > { %p43_p13 = por %p42_p10, %p41_p12  ;;  %p1558_p0 = scmp.eq.s32.totalorder %s1273_s0, 1 }
  0x29   : > { %s1332_s13 = sand.u32 1, %s1205_s20   ;;  %s964_s14 = smul.u32 768, %s1209_s21 }
  0x2a   : > { %p1327_p3 = por %p1558_p0, %p41_p12  ;;  %s963_s15 = smul.u32 48, %s1332_s13 }
  0x2b   : > { %s1560_s1 = sld [smem:[#allocation16_spill]]  ;;  %p1341_p11 = pnand %p998_p2, %p43_p13 }
  0x2c   : > { %s1559_s12 = scalar_select %p1327_p3, 1, 0 }
  0x2d   : > { %s161_s27 = scalar_lea.vmem [#allocation4], %s963_s15  ;;  %s158_s30 = scalar_lea.sflag [#allocation5], %s1332_s13 }
  0x2e   : > { %s168_s28 = sshll.u32 %s161_s27, 4  ;;  %p1081_p7 = pneg %p1341_p11  ;;  %s1345_s28 = int_to_ptr.vmem [resolvable:$true] %s168_s28 }
  0x31   : > { %s1339_s22 = scalar_lea.hbm %s1560_s1, %s964_s14  ;;  %s1084_s8 = scalar_lea.hbm %s1560_s1, 1536 }
  0x32   : > { %s1079_s5 = scalar_lea.hbm %s1339_s22, 768  ;;  %p1085_p10 = scmp.lt.s32.totalorder %s1339_s22, %s1560_s1 }
  0x33   : > { %p1080_p5 = scmp.ne.s32.totalorder %s1339_s22, %s1079_s5  ;;  %p1086_p2 = scmp.lt.s32.totalorder %s1084_s8, %s1079_s5 }
  0x35   : > { %p1082_p9 = pnand %p1081_p7, %p1080_p5  ;;  %p1087_p13 = por %p1086_p2, %p1085_p10 }
  0x37   : > { %p1083_p12 = pneg %p1082_p9 }
  0x39   : > { %p1088_p0 = pnand %p1087_p13, %p1083_p12 }
  0x3b   : > { %1091 = shalt.err (!%p1088_p0)
}
  0x3c   : > { %s1092_s14 = scalar_lea.vmem %s1345_s28, 768  ;;  %s1215_s15 = smov [#allocation4]  }
  0x3d   : > { %p1093_p1 = scmp.ne.s32.totalorder %s1345_s28, %s1092_s14  ;;  %s1097_s16 = sshll.u32 %s1215_s15, 4  ;;  %s1098_s16 = int_to_ptr.vmem [resolvable:$false] %s1097_s16 }
  0x3e   : > { %s1099_s17 = scalar_lea.vmem %s1098_s16, 1536  ;;  %p1100_p6 = scmp.lt.s32.totalorder %s1345_s28, %s1098_s16 }
  0x3f   : > { %p1095_p5 = pnand %p1093_p1, %p1081_p7  ;;  %p1101_p3 = scmp.lt.s32.totalorder %s1099_s17, %s1092_s14 }
  0x41   : > { %p1096_p9 = pneg %p1095_p5  ;;  %p1102_p4 = por %p1101_p3, %p1100_p6 }
  0x43   : > { %p1103_p10 = pnand %p1102_p4, %p1096_p9 }
  0x45   : > { %1106 = shalt.err (!%p1103_p10)
}
  0x46   : > { %s1216_s27 = smov 128   ;;  %s1217_s5 = smov 8  }
  0x47   : > { %989 = dma.hbm_to_vmem [thread:$0]  (!%p1341_p11), %s1339_s22, 768, %s1345_s28, %s158_s30, %s1216_s27, %s1216_s27, %s1217_s5  }
  0x48   : > { %s178_s6 = sand.u32 1, %s1209_s21   ;;  %s965_s7 = smul.u32 24, %s1332_s13 }
  0x49   : > { %s966_s8 = smul.u32 384, %s1209_s21  ;;  %s179_s17 = scalar_lea.sflag [#allocation8], %s178_s6 }
  0x4a   : > { %s182_s15 = scalar_lea.vmem [#allocation7], %s965_s7  ;;  %s1112_s28 = scalar_lea.hbm %s1547_s2, 768 }
  0x4b   : > { %s1383_s14 = scalar_lea.hbm %s1547_s2, %s966_s8  ;;  %s189_s16 = sshll.u32 %s182_s15, 4  ;;  %s1385_s16 = int_to_ptr.vmem [resolvable:$true] %s189_s16 }
  0x4c   : > { %s1107_s1 = scalar_lea.hbm %s1383_s14, 384  ;;  %p1113_p3 = scmp.lt.s32.totalorder %s1383_s14, %s1547_s2 }
  0x4d   : > { %p1108_p1 = scmp.ne.s32.totalorder %s1383_s14, %s1107_s1  ;;  %p1114_p12 = scmp.lt.s32.totalorder %s1112_s28, %s1107_s1 }
  0x4f   : > { %p1110_p4 = pnand %p1108_p1, %p1081_p7  ;;  %p1115_p2 = por %p1114_p12, %p1113_p3 }
  0x51   : > { %p1111_p6 = pneg %p1110_p4 }
  0x53   : > { %p1116_p13 = pnand %p1115_p2, %p1111_p6 }
  0x55   : > { %1119 = shalt.err (!%p1116_p13)
}
  0x56   : > { %s1120_s6 = scalar_lea.vmem %s1385_s16, 384  ;;  %s1218_s7 = smov [#allocation7]  }
  0x57   : > { %p1121_p0 = scmp.ne.s32.totalorder %s1385_s16, %s1120_s6  ;;  %s1125_s9 = sshll.u32 %s1218_s7, 4  ;;  %s1126_s9 = int_to_ptr.vmem [resolvable:$false] %s1125_s9 }
  0x58   : > { %s1127_s10 = scalar_lea.vmem %s1126_s9, 768  ;;  %p1128_p10 = scmp.lt.s32.totalorder %s1385_s16, %s1126_s9 }
  0x59   : > { %p1123_p5 = pnand %p1121_p0, %p1081_p7  ;;  %p1129_p1 = scmp.lt.s32.totalorder %s1127_s10, %s1120_s6 }
  0x5b   : > { %p1124_p9 = pneg %p1123_p5  ;;  %p1130_p4 = por %p1129_p1, %p1128_p10 }
  0x5d   : > { %p1131_p3 = pnand %p1130_p4, %p1124_p9 }
  0x5f   : > { %1134 = shalt.err (!%p1131_p3)
}
  0x60   : > { %992 = dma.hbm_to_vmem [thread:$0]  (!%p1341_p11), %s1383_s14, 384, %s1385_s16, %s179_s17, %s1216_s27, %s1216_s27, %s1217_s5  }
  0x61   : > { %201 = sbr.rel (%p1292_p8) target bundleno = 560 (0x230), region = 32  ;;  %s1415_s1 = sand.u32 (!%p1292_p8), 1, %s1201_s19  }
  0x62   : > { %s967_s15 = smul.u32 (!%p1292_p8), 48, %s1415_s1  ;;  %s204_s13 = scalar_lea.sflag (!%p1292_p8), [#allocation5], %s1415_s1 }
  0x63   : > { %p1562_p7 = scmp.ne.s32.totalorder (!%p1292_p8), %s1554_s23, 0 }
  0x64   : > { %s1421_s26 = scalar_lea.vmem (!%p1292_p8), [#allocation4], %s967_s15 }
  0x66   : > { %1180 = dma.done.wait (%p1562_p7), %s204_s13, 768  }
  0x67   : > { %1182 = vsyncadd (%p1562_p7), %s204_s13, 4294966528  ;;  %s212_s25 = sand.u32 1, %s1273_s0   ;;  %s968_s27 = smul.u32 24, %s1415_s1 }
  0x68   : > { %s213_s5 = scalar_lea.sflag [#allocation8], %s212_s25 }
  0x69   : > { %s1429_s14 = scalar_lea.vmem [#allocation7], %s968_s27 }
  0x6a   : > { %1184 = dma.done.wait (%p1562_p7), %s213_s5, 384  }
  0x6b   : > { %1186 = vsyncadd (%p1562_p7), %s213_s5, 4294966912  ;;  %p1563_p8 = scmp.eq.s32.totalorder %s1273_s0, 0 }
  0x6d   : > { %1188 = dma.done.wait (%p1563_p8), [#allocation8], 1024   ;;  %p1564_p11 = pmov %p1563_p8 }
  0x6e   : > { %v1219_v0 = vmov 0.0   ;;  %v264_v1 = vld [vmem:[#allocation9 + $0x38] sm:$0xff]  ;;  %v263_v2 = vld [vmem:[#allocation9 + $0x30] sm:$0xff]  ;;  %v262_v3 = vld [vmem:[#allocation9 + $0x28] sm:$0xff]  ;;  %vm265_vm0 = vcmask 261120   ;;  %vm1220_vm1 = vmmov 0   ;;  %v538_v49 = vlaneseq }
  0x6f   : > { %1190 = vsyncadd (%p1564_p11), [#allocation8], 4294966272  ;;  %339 = vmatprep.mubr.f32.mxu0 %v1219_v0  ;;  %915 = vmatprep.subr.mxu1 %v1219_v0  ;;  %v261_v4 = vld [vmem:[#allocation9 + $0x20] sm:$0xff]  ;;  %v260_v5 = vld [vmem:[#allocation9 + $0x18] sm:$0xff]  ;;  %s248_s23 = sld [smem:[#allocation3 + %s1273_s0]]  ;;  %vm361_vm2 = vcmask 195584  }
  0x70   : > { %299 = vmatprep.subr.mxu0 %v264_v1  ;;  %v259_v6 = vld [vmem:[#allocation9 + $0x10] sm:$0xff]  ;;  %v258_v7 = vld [vmem:[#allocation9 + $0x8] sm:$0xff]  ;;  %v257_v8 = vld [vmem:[#allocation9] sm:$0xff]  ;;  %921 = vmatprep.mubr.msk.f32.mxu1 %vm1220_vm1, %v1219_v0  ;;  %v539_v52 = vshrl.u32 %v538_v49, 7  ;;  %s971_s28 = smul.u32 768, %s1273_s0  ;;  %s247_s30 = scalar_lea.vmem [#allocation10], %s967_s15 }
  0x71   : > { %300 = vmatpush1.msra.mxu0 %v263_v2  ;;  %v254_v9 = vld [vmem:[%s1429_s14] sm:$0xff]  ;;  %v255_v10 = vld [vmem:[%s1429_s14 + $0x8] sm:$0xff]  ;;  %v256_v11 = vld [vmem:[%s1429_s14 + $0x10] sm:$0xff]  ;;  %s765_s8 = sshll.u32 %s247_s30, 4  ;;  %s752_s0 = scalar_lea.sflag [#allocation6], %s1415_s1  ;;  %s1502_s8 = int_to_ptr.vmem [resolvable:$true] %s765_s8 }
  0x72   : > { %301 = vmatprep.subr.mxu0 %v262_v3  ;;  %v358_v14 = vld [vmem:[%s1421_s26] sm:$0xff]  ;;  %v359_v15 = vld [vmem:[%s1421_s26 + $0x8] sm:$0xff]  ;;  %v360_v18 = vld [vmem:[%s1421_s26 + $0x10] sm:$0xff]  ;;  %v540_v57 = vsub.s32 0, %v539_v52  ;;  %s1500_s9 = scalar_lea.hbm %s1549_s4, %s971_s28  ;;  %s1135_s10 = scalar_lea.vmem %s1502_s8, 768 }
  0x73   : > { %302 = vmatpush1.msra.mxu0 %v261_v4  ;;  %v451_v16 = vsel %vm361_vm2, %v358_v14, 0.0  ;;  %v452_v17 = vsel %vm361_vm2, %v359_v15, 0.0  ;;  %v885_v20 = vld [vmem:[%s1421_s26 + $0x18] sm:$0xff]  ;;  %v886_v21 = vld [vmem:[%s1421_s26 + $0x20] sm:$0xff]  ;;  %v454_v22 = vsel %vm361_vm2, %v360_v18, 0.0  ;;  %v887_v26 = vld [vmem:[%s1421_s26 + $0x28] sm:$0xff]  ;;  %p1136_p6 = scmp.ne.s32.totalorder %s1502_s8, %s1135_s10 }
  0x74   : > { %303 = vmatprep.subr.mxu0 %v260_v5  ;;  %v453_v19 = vadd.f32 %v452_v17, %v451_v16  ;;  %v648_v23 = vsel %vm361_vm2, %v885_v20, 0.0  ;;  %v649_v24 = vsel %vm361_vm2, %v886_v21, 0.0  ;;  %v651_v29 = vsel %vm361_vm2, %v887_v26, 0.0  ;;  %p1565_p12 = scmp.ne.s32.totalorder %s1559_s12, 0  ;;  %s1221_s15 = smov [#allocation10]  }
  0x75   : > { %304 = vmatpush1.msra.mxu0 %v259_v6  ;;  %s249_s16 = scvt.s32.f32 %s248_s23  ;;  %v650_v28 = vadd.f32 %v649_v24, %v648_v23  ;;  %s1139_s13 = sshll.u32 %s1221_s15, 4  ;;  %s1140_s13 = int_to_ptr.vmem [resolvable:$false] %s1139_s13 }
  0x76   : > { %305 = vmatprep.subr.mxu0 %v258_v7  ;;  %v455_v25 = vadd.f32 %v454_v22, %v453_v19  ;;  %p1137_p2 = pnand %p1136_p6, %p1565_p12  ;;  %s1141_s26 = scalar_lea.vmem %s1140_s13, 1536 }
  0x77   : > { %306 = vmatpush1.msra.mxu0 %v257_v8  ;;  %s250_s17 = sadd.f32 50.0, %s249_s16  ;;  %v652_v33 = vadd.f32 %v651_v29, %v650_v28  ;;  %p1142_p0 = scmp.lt.s32.totalorder %s1502_s8, %s1140_s13 }
  0x78   : > { %878 = vmatmul.mubr.msk.f32.vlgmr.msra.gmra.mxu0 %vm265_vm0, %v254_v9  ;;  %939 = vmatprep.subr.mxu0 %v1219_v0  ;;  %v456_v31 = vrot.slane %v455_v25, 4  ;;  %p1138_p13 = pneg %p1137_p2  ;;  %p1143_p5 = scmp.lt.s32.totalorder %s1141_s26, %s1135_s10 }
  0x79   : > { %345 = vmatprep.mubr.f32.mxu0 %v1219_v0  ;;  %v251_v12 = vstv %s250_s17  ;;  %v653_v37 = vrot.slane %v652_v33, 4 }
  0x7a   : > { %1043 = vrcp.f32 %v251_v12  ;;  %v457_v35 = vadd.f32 %v456_v31, %v455_v25  ;;  %p1144_p9 = por %p1143_p5, %p1142_p0 }
  0x7b   : > { %v654_v40 = vadd.f32 %v653_v37, %v652_v33 }
  0x7c   : > { %879 = vmatmul.mubr.msk.f32.gmra.mxu0 %vm265_vm0, %v255_v10  ;;  %v458_v39 = vrot.slane %v457_v35, 2  ;;  %p1145_p10 = pnand %p1144_p9, %p1138_p13 }
  0x7d   : > { %351 = vmatprep.mubr.f32.mxu0 %v1219_v0  ;;  %v655_v42 = vrot.slane %v654_v40, 2 }
  0x7e   : > { %v459_v41 = vadd.f32 %v458_v39, %v457_v35 }
  0x7f   : > { %v656_v44 = vadd.f32 %v655_v42, %v654_v40 }
  0x80   : > { %880 = vmatmul.mubr.msk.f32.gmra.mxu0 %vm265_vm0, %v256_v11  ;;  %v460_v43 = vrot.slane %v459_v41, 1 }
  0x81   : > { %945 = vmatprep.mubr.msk.f32.mxu0 %vm1220_vm1, %v1219_v0  ;;  %v657_v46 = vrot.slane %v656_v44, 1 }
  0x82   : > { %v461_v45 = vadd.f32 %v460_v43, %v459_v41 }
  0x83   : > { %v658_v47 = vadd.f32 %v657_v46, %v656_v44 }
  0x87   : > { %v1044_v13 = vpop.eup %1043 }
  0x88   : > { %969 = vpush %v1044_v13 }
  0xb9   : > { %s970_s22 = spop %969 }
  0xba   : > { %v545_v3 = vstv %s970_s22 }
 0x138   : > { %v341_v27 = vpop.f32.mrf.mxu0 }
 0x13a   : > { %v343_v30 = vpop.f32.mrf.mxu0 }
 0x13c   : > { %v347_v32 = vpop.f32.mrf.mxu0 }
 0x13e   : > { %v349_v34 = vpop.f32.mrf.mxu0 }
 0x140   : > { %v353_v36 = vpop.f32.mrf.mxu0 }
 0x141   : > { %916 = vmatpush3.msra.mxu1 %v353_v36 }
 0x142   : > { %v355_v38 = vpop.f32.mrf.mxu0  ;;  %917 = vmatprep.subr.mxu1 %v1219_v0 }
 0x143   : > { %918 = vmatpush3.msra.mxu1 %v347_v32  ;;  %940 = vmatpush3.msra.mxu0 %v355_v38 }
 0x144   : > { %919 = vmatprep.subr.mxu1 %v1219_v0  ;;  %941 = vmatprep.subr.mxu0 %v1219_v0 }
 0x145   : > { %920 = vmatpush3.msra.mxu1 %v341_v27  ;;  %942 = vmatpush3.msra.mxu0 %v349_v34 }
 0x146   : > { %922 = vmatmul.mubr.msk.f32.vlgmr.msra.gmra.mxu1 %vm361_vm2, %v358_v14  ;;  %930 = vmatprep.subr.mxu1 %v1219_v0 }
 0x147   : > { %943 = vmatprep.subr.mxu0 %v1219_v0  ;;  %931 = vmatpush3.msra.mxu1 %v353_v36 }
 0x148   : > { %944 = vmatpush3.msra.mxu0 %v343_v30  ;;  %932 = vmatprep.subr.mxu1 %v1219_v0 }
 0x149   : > { %924 = vmatprep.mubr.msk.f32.mxu1 %vm1220_vm1, %v1219_v0  ;;  %933 = vmatpush3.msra.mxu1 %v347_v32 }
 0x14a   : > { %925 = vmatmul.mubr.msk.f32.gmra.mxu1 %vm361_vm2, %v359_v15  ;;  %934 = vmatprep.subr.mxu1 %v1219_v0 }
 0x14b   : > { %935 = vmatpush3.msra.mxu1 %v341_v27  ;;  %927 = vmatprep.mubr.msk.f32.mxu1 %vm1220_vm1, %v1219_v0 }
 0x14c   : > { %946 = vmatmul.mubr.msk.f32.vlgmr.msra.gmra.mxu0 %vm361_vm2, %v885_v20  ;;  %954 = vmatprep.subr.mxu1 %v1219_v0 }
 0x14d   : > { %948 = vmatprep.mubr.msk.f32.mxu0 %vm1220_vm1, %v1219_v0 }
 0x14e   : > { %928 = vmatmul.mubr.msk.f32.gmra.mxu1 %vm361_vm2, %v360_v18 }
 0x14f   : > { %936 = vmatprep.mubr.msk.f32.mxu1 %vm1220_vm1, %v1219_v0 }
 0x150   : > { %949 = vmatmul.mubr.msk.f32.gmra.mxu0 %vm361_vm2, %v886_v21 }
 0x151   : > { %951 = vmatprep.mubr.msk.f32.mxu0 %vm1220_vm1, %v1219_v0 }
 0x152   : > { %937 = vmatmul.mubr.msk.f32.vlgmr.msra.gmra.mxu1 %vm361_vm2, %v461_v45 }
 0x153   : > { %955 = vmatpush3.msra.mxu1 %v355_v38  ;;  %960 = vmatprep.mubr.msk.f32.mxu1 %vm1220_vm1, %v1219_v0 }
 0x154   : > { %956 = vmatprep.subr.mxu1 %v1219_v0  ;;  %952 = vmatmul.mubr.msk.f32.gmra.mxu0 %vm361_vm2, %v887_v26 }
 0x155   : > { %957 = vmatpush3.msra.mxu1 %v349_v34 }
 0x156   : > { %958 = vmatprep.subr.mxu1 %v1219_v0 }
 0x157   : > { %959 = vmatpush3.msra.mxu1 %v343_v30 }
 0x158   : > { %961 = vmatmul.mubr.msk.f32.vlgmr.msra.gmra.mxu1 %vm361_vm2, %v658_v47 }
 0x206   : > { %v437_v48 = vpop.f32.mrf.mxu1 }
 0x207   : > { %v535_v62 = vmul.f32 50.0, %v437_v48 }
 0x208   : > { %v923_v50 = vpop.f32.mrf.mxu1 }
 0x20a   : > { %v442_v51 = vpop.f32.mrf.mxu1 }
 0x20b   : > { %v536_v63 = vmul.f32 50.0, %v442_v51 }
 0x20c   : > { %v926_v53 = vpop.f32.mrf.mxu1  ;;  %v634_v54 = vpop.f32.mrf.mxu0 }
 0x20d   : > { %v732_v13 = vmul.f32 50.0, %v634_v54 }
 0x20e   : > { %v447_v55 = vpop.f32.mrf.mxu1  ;;  %v947_v56 = vpop.f32.mrf.mxu0 }
 0x20f   : > { %v537_v0 = vmul.f32 50.0, %v447_v55 }
 0x210   : > { %v929_v58 = vpop.f32.mrf.mxu1  ;;  %v639_v59 = vpop.f32.mrf.mxu0 }
 0x211   : > { %v733_v14 = vmul.f32 50.0, %v639_v59 }
 0x212   : > { %v531_v60 = vpop.f32.mrf.mxu1  ;;  %v950_v61 = vpop.f32.mrf.mxu0 }
 0x213   : > { %v541_v1 = vrot.slane %v531_v60, %v540_v57 }
 0x214   : > { %v938_v2 = vpop.f32.mrf.mxu1  ;;  %v644_v4 = vpop.f32.mrf.mxu0 }
 0x215   : > { %v542_v5 = vadd.f32 %v541_v1, %v535_v62  ;;  %v543_v6 = vadd.f32 %v541_v1, %v536_v63  ;;  %v544_v7 = vadd.f32 %v541_v1, %v537_v0  ;;  %v734_v12 = vmul.f32 50.0, %v644_v4 }
 0x216   : > { %v953_v8 = vpop.f32.mrf.mxu0 }
 0x217   : > { %v546_v9 = vmul.f32 %v545_v3, %v542_v5  ;;  %v547_v10 = vmul.f32 %v545_v3, %v543_v6  ;;  %v548_v11 = vmul.f32 %v545_v3, %v544_v7 }
 0x218   : > { %v728_v15 = vpop.f32.mrf.mxu1 }
 0x219   : > { %v549_v16 = vmax.f32 %v546_v9, 0.0  ;;  %v550_v17 = vmax.f32 %v547_v10, 0.0  ;;  %v551_v18 = vmax.f32 %v548_v11, 0.0  ;;  %v738_v19 = vrot.slane %v728_v15, %v540_v57 }
 0x21a   : > { %v962_v20 = vpop.f32.mrf.mxu1 }
 0x21b   : > { %552 = vst [vmem:[%s247_s30] sm:$0xff] %v549_v16  ;;  %553 = vst [vmem:[%s247_s30 + $0x10] sm:$0xff] %v550_v17  ;;  %v739_v21 = vadd.f32 %v738_v19, %v732_v13  ;;  %v740_v22 = vadd.f32 %v738_v19, %v733_v14  ;;  %v741_v23 = vadd.f32 %v738_v19, %v734_v12 }
 0x21c   : > { %554 = vst [vmem:[%s247_s30 + $0x20] sm:$0xff] %v551_v18 }
 0x21d   : > { %v742_v24 = vmul.f32 %v739_v21, %v545_v3  ;;  %v743_v25 = vmul.f32 %v740_v22, %v545_v3  ;;  %v744_v26 = vmul.f32 %v741_v23, %v545_v3 }
 0x21f   : > { %v745_v27 = vmax.f32 %v742_v24, 0.0  ;;  %v746_v28 = vmax.f32 %v743_v25, 0.0  ;;  %v747_v29 = vmax.f32 %v744_v26, 0.0 }
 0x221   : > { %748 = vst [vmem:[%s247_s30 + $0x8] sm:$0xff] %v745_v27  ;;  %749 = vst [vmem:[%s247_s30 + $0x18] sm:$0xff] %v746_v28 }
 0x222   : > { %750 = vst [vmem:[%s247_s30 + $0x28] sm:$0xff] %v747_v29 }
 0x223   : > { %1148 = shalt.err (!%p1145_p10)
}
 0x224   : > { %s1149_s25 = scalar_lea.hbm %s1500_s9, 768  ;;  %s1153_s14 = scalar_lea.hbm %s1549_s4, 1536 }
 0x225   : > { %p1150_p1 = scmp.ne.s32.totalorder %s1500_s9, %s1149_s25  ;;  %p1154_p7 = scmp.lt.s32.totalorder %s1500_s9, %s1549_s4 }
 0x226   : > { %p1155_p8 = scmp.lt.s32.totalorder %s1153_s14, %s1149_s25 }
 0x227   : > { %p1151_p4 = pnand %p1150_p1, %p1565_p12 }
 0x228   : > { %p1156_p11 = por %p1155_p8, %p1154_p7 }
 0x229   : > { %p1152_p3 = pneg %p1151_p4 }
 0x22b   : > { %p1157_p6 = pnand %p1156_p11, %p1152_p3 }
 0x22d   : > { %1160 = shalt.err (!%p1157_p6)
}
 0x22e   : > { %s1222_s17 = smov 256   ;;  %s1223_s22 = smov 16  }
 0x22f   : > { %980 = dma.vmem_to_hbm [thread:$0]  (%p1565_p12), %s1502_s8, 768, %s1500_s9, %s752_s0, %s1222_s17, %s1222_s17, %s1223_s22  }
 0x230 PF: > { %s780_s28 = sand.u32 1, %s1197_s18   ;;  %p1566_p2 = scmp.ne.s32.totalorder %s1555_s24, 0 }
 0x231   : > { %p1567_p13 = scmp.ge.s32.totalorder %s1209_s21, 2  ;;  %s781_s30 = scalar_lea.sflag [#allocation6], %s780_s28 }
 0x233   : > { %p994_p0 = pnand %p1567_p13, %p1566_p2 }
 0x235   : > { %p995_p5 = pneg %p994_p0 }
 0x237   : > { %1192 = dma.done.wait (%p995_p5), %s781_s30, 768  }
 0x238   : > { %1194 = vsyncadd (%p995_p5), %s781_s30, 4294966528  ;;  %p24_p9 = scmp.ge.s32.totalorder %s1306_s29, 4   ;;  %s1568_s18 = smov %s1201_s19 }
 0x239   : > { %s1569_s19 = smov %s1205_s20  ;;  %s1570_s20 = smov %s1323_s11 }
 0x23a   : > { %s1571_s21 = smov %s1306_s29  ;;  %26 = sbr.rel (!%p24_p9) target bundleno = 13 (0xd), region = 95 }
 0x23f   :  { %786 = vsyncpa [#allocation5], 1 }
 0x240   :  { %788 = vsyncpa [#allocation5 + $0x1], 1 }
 0x241   :  { %789 = vsyncpa [#allocation8], 1 }
 0x242   :  { %791 = vsyncpa [#allocation8 + $0x1], 1 }
 0x243   :  { %792 = vsyncpa [#allocation6], 1 }
 0x244   :  { %794 = vsyncpa [#allocation6 + $0x1], 1 }

</bundles_post_ra>
